<compile_context>
chip_gen: v6e
topology: v6e:2x2x1
jax: 0.10.0
libtpu: 0.0.40
codegen_flags: <defaults>
</compile_context>

<pallas_src>
import functools

import jax
import jax.numpy as jnp
from jax import lax
from jax.experimental import pallas as pl
from jax.experimental.pallas import tpu as pltpu

_SUB = 16  # sublane quantum for row tiles (covers f32 (8) and bf16 (16) packing)


def _round_up(x: int, m: int) -> int:
    return (x + m - 1) // m * m


def _vmem_cap_bytes() -> int:
    """~85% of per-TensorCore VMEM; conservative v7x default if query fails."""
    try:
        cap = int(pltpu.get_tpu_info().vmem_capacity_bytes)
    except Exception:
        cap = 64 << 20  # v7x is the smallest; safe fallback for all chips
    return int(cap * 0.85)


def _num_tensorcores() -> int:
    """Best-effort TensorCores-per-chip; defaults to 1 (v5e/v6e)."""
    try:
        info = pltpu.get_tpu_info()
        for attr in ("num_cores", "core_count", "tensor_core_count",
                     "num_tensorcores"):
            val = getattr(info, attr, None)
            if val:
                return int(val)
    except Exception:
        pass
    try:
        if "v7" in jax.devices()[0].device_kind.lower():
            return 2
    except Exception:
        pass
    return 1


# ----------------------------- kernels --------------------------------------


def _qkv_resident_kernel(x_ref, w_ref, b_ref, q_ref, k_ref, v_ref, *, h_pad):
    """One grid step: one fused (tm, d_pad) @ (d_pad, 3*h_pad) MXU matmul.

    The bias is added per h_pad-wide output slice (keeps only the matmul
    accumulator live at full 3*h_pad width).
    """
    acc = jnp.dot(x_ref[...], w_ref[...], preferred_element_type=jnp.float32)
    for idx, o_ref in enumerate((q_ref, k_ref, v_ref)):
        lo = idx * h_pad
        o_ref[...] = (acc[:, lo:lo + h_pad]
                      + b_ref[:, lo:lo + h_pad]).astype(o_ref.dtype)


def _qkv_streaming_kernel(x_ref, w_ref, b_ref, o_ref):
    """Column-tiled step: (tm, d_pad) @ (d_pad, tn) -> fused output tile."""
    acc = jnp.dot(x_ref[...], w_ref[...], preferred_element_type=jnp.float32)
    o_ref[...] = (acc + b_ref[...]).astype(o_ref.dtype)


# ----------------------------- wrapper ---------------------------------------


@functools.partial(
    jax.jit,
    static_argnames=("num_heads", "tm", "tn", "compute_dtype", "out_dtype",
                     "weight_resident"))
def project_before_msa(x, wq, bq, wk, bk, wv, bv, *, num_heads,
                       tm=512, tn=512, compute_dtype=None, out_dtype=None,
                       weight_resident=None):
    """JAX/Pallas equivalent of ProjectBeforeMSA.forward.

    x:  (B, N, D_in)
    w*: (D_in, H)   (transposed vs. torch's (H, D_in) Linear weight)
    b*: (H,)
    compute_dtype: None -> x.dtype (f32-exact like the PyTorch module);
                   pass jnp.bfloat16 explicitly for bf16 MXU (f32 accumulate).
    out_dtype:     None -> x.dtype; pass jnp.bfloat16 if downstream attention
                   consumes bf16 (halves output HBM traffic).
    weight_resident: None -> auto (chip-aware VMEM budget); True/False forces
                   the resident / streaming path.
    Returns q, k, v each of shape (B, N, num_heads, head_dim).
    """
    b, n, d_in = x.shape
    h = wq.shape[1]
    assert h % num_heads == 0, "hidden_dim must be a multiple of num_heads"
    head_dim = h // num_heads

    compute_dtype = jnp.dtype(x.dtype if compute_dtype is None else compute_dtype)
    out_dtype = jnp.dtype(x.dtype if out_dtype is None else out_dtype)
    cd_bytes = compute_dtype.itemsize
    out_bytes = out_dtype.itemsize

    m = b * n
    d_pad = _round_up(d_in, 128)       # lane-dense x loads / weight rows
    h_pad = _round_up(h, 128)          # lane-dense output stores
    m_pad = _round_up(m, _SUB)         # tiny row quantum only (<= 15 wasted rows)

    tm_eff = min(_round_up(max(tm, _SUB), _SUB), m_pad)
    # Keep >= 2 row tiles only on 2-TensorCore chips (v7x); on v5e/v6e the grid
    # is a serial loop and halving the tile only adds per-step overhead.
    if _num_tensorcores() >= 2 and pl.cdiv(m_pad, tm_eff) < 2 and m_pad >= 2 * _SUB:
        tm_eff = _round_up(pl.cdiv(m_pad, 2), _SUB)

    cap = _vmem_cap_bytes()

    def resident_need(tm_):
        return (d_pad * 3 * h_pad * cd_bytes          # fused weight, 1 buffer
                + 3 * h_pad * 4                       # fused bias (f32)
                + 2 * tm_ * d_pad * cd_bytes          # x tile, double-buffered
                + 2 * 3 * tm_ * h_pad * out_bytes     # q/k/v tiles, double-buffered
                + tm_ * 3 * h_pad * 4)                # f32 matmul accumulator

    def streaming_need(tm_, tn_):
        return (2 * tm_ * d_pad * cd_bytes            # x tile
                + 2 * d_pad * tn_ * cd_bytes          # weight column tile
                + 2 * tn_ * 4                         # bias tile
                + 2 * tm_ * tn_ * out_bytes           # fused output tile
                + tm_ * tn_ * 4)                      # f32 accumulator

    if weight_resident is None:
        tm_res = tm_eff
        while resident_need(tm_res) > cap and tm_res > 128:
            tm_res = max(128, _round_up(tm_res // 2, _SUB))
        use_resident = resident_need(tm_res) <= cap
        if use_resident:
            tm_eff = tm_res
    else:
        use_resident = bool(weight_resident)

    # --- host-side glue (skipped when already aligned) ------------------------
    x2d = x.reshape(m, d_in)
    if x2d.dtype != compute_dtype:
        x2d = x2d.astype(compute_dtype)
    if m_pad != m or d_pad != d_in:
        x2d = jnp.pad(x2d, ((0, m_pad - m), (0, d_pad - d_in)))

    def _prep_w(w):
        w = w.astype(compute_dtype)
        if d_pad != d_in or h_pad != h:
            w = jnp.pad(w, ((0, d_pad - d_in), (0, h_pad - h)))
        return w

    def _prep_b(bias):
        bias = bias.astype(jnp.float32)
        if h_pad != h:
            bias = jnp.pad(bias, (0, h_pad - h))
        return bias

    w_fused = jnp.concatenate([_prep_w(wq), _prep_w(wk), _prep_w(wv)], axis=1)
    b_fused = jnp.concatenate([_prep_b(bq), _prep_b(bk), _prep_b(bv)]
                              ).reshape(1, 3 * h_pad)

    # --- path 1: resident fused weight, 1-D grid over row tiles ---------------
    if use_resident:
        need = resident_need(tm_eff)
        while need > cap and tm_eff > _SUB:        # only reachable when forced
            tm_eff = max(_SUB, _round_up(tm_eff // 2, _SUB))
            need = resident_need(tm_eff)
        grid_m = pl.cdiv(m_pad, tm_eff)

        out_struct = jax.ShapeDtypeStruct((m_pad, h_pad), out_dtype)
        cost = pl.CostEstimate(
            flops=2 * m_pad * d_pad * 3 * h_pad,
            transcendentals=0,
            bytes_accessed=(m_pad * d_pad * cd_bytes
                            + d_pad * 3 * h_pad * cd_bytes
                            + 3 * h_pad * 4
                            + 3 * m_pad * h_pad * out_bytes))

        kernel = functools.partial(_qkv_resident_kernel, h_pad=h_pad)
        q2d, k2d, v2d = pl.pallas_call(
            kernel,
            out_shape=(out_struct, out_struct, out_struct),
            grid_spec=pltpu.PrefetchScalarGridSpec(
                num_scalar_prefetch=0,
                grid=(grid_m,),
                in_specs=[
                    pl.BlockSpec((tm_eff, d_pad), lambda i: (i, 0)),
                    # Grid-invariant operands: keep resident, single buffer.
                    pl.BlockSpec((d_pad, 3 * h_pad), lambda i: (0, 0),
                                 pipeline_mode=pl.Buffered(1)),
                    pl.BlockSpec((1, 3 * h_pad), lambda i: (0, 0),
                                 pipeline_mode=pl.Buffered(1)),
                ],
                out_specs=[pl.BlockSpec((tm_eff, h_pad), lambda i: (i, 0))] * 3,
            ),
            compiler_params=pltpu.CompilerParams(
                dimension_semantics=("parallel",),
                vmem_limit_bytes=int(min(max(int(need * 1.25), 16 << 20), cap)),
            ),
            cost_estimate=cost,
        )(x2d, w_fused, b_fused)

        def _crop(o):
            if m_pad != m or h_pad != h:
                o = o[:m, :h]
            return o.reshape(b, n, num_heads, head_dim)

        # TODO(synk): optionally return the fused (B, N, 3, heads, head_dim)
        # slab when the downstream MSA kernel can index it directly.
        return _crop(q2d), _crop(k2d), _crop(v2d)

    # --- path 2: streaming (column-tiled) weight, fused output ----------------
    ch = 3 * h_pad
    tn_eff = min(_round_up(max(tn, 128), 128), ch)
    need = streaming_need(tm_eff, tn_eff)
    while need > cap:
        if tn_eff > 128:
            tn_eff = max(128, (tn_eff // 2) // 128 * 128)
        elif tm_eff > _SUB:
            tm_eff = max(_SUB, _round_up(tm_eff // 2, _SUB))
        else:
            break
        need = streaming_need(tm_eff, tn_eff)
    grid_m = pl.cdiv(m_pad, tm_eff)
    grid_n = pl.cdiv(ch, tn_eff)

    cost = pl.CostEstimate(
        flops=2 * m_pad * d_pad * ch,
        transcendentals=0,
        bytes_accessed=(m_pad * d_pad * cd_bytes
                        + grid_m * d_pad * ch * cd_bytes   # weight re-read / row tile
                        + ch * 4
                        + m_pad * ch * out_bytes))

    fused = pl.pallas_call(
        _qkv_streaming_kernel,
        out_shape=jax.ShapeDtypeStruct((m_pad, ch), out_dtype),
        grid_spec=pltpu.PrefetchScalarGridSpec(
            num_scalar_prefetch=0,
            grid=(grid_m, grid_n),
            in_specs=[
                pl.BlockSpec((tm_eff, d_pad), lambda i, j: (i, 0)),
                pl.BlockSpec((d_pad, tn_eff), lambda i, j: (0, j)),
                pl.BlockSpec((1, tn_eff), lambda i, j: (0, j)),
            ],
            out_specs=pl.BlockSpec((tm_eff, tn_eff), lambda i, j: (i, j)),
        ),
        compiler_params=pltpu.CompilerParams(
            dimension_semantics=("parallel", "parallel"),
            vmem_limit_bytes=int(min(max(int(need * 1.25), 16 << 20), cap)),
        ),
        cost_estimate=cost,
    )(x2d, w_fused, b_fused)

    def _slice(idx):
        lo = idx * h_pad
        return fused[:m, lo:lo + h].reshape(b, n, num_heads, head_dim)

    return _slice(0), _slice(1), _slice(2)


# ----------------------------- demo / check ----------------------------------


def _init_linear(key, in_dim, out_dim, dtype=jnp.float32):
    """torch-Linear-style init, weight returned transposed to (in, out)."""
    kw, kb = jax.random.split(key)
    bound = 1.0 / (in_dim ** 0.5)
    w = jax.random.uniform(kw, (in_dim, out_dim), dtype, -bound, bound)
    bias = jax.random.uniform(kb, (out_dim,), dtype, -bound, bound)
    return w, bias


if __name__ == "__main__":
    # Small shapes consistent with the module: batch=2, seq=8, input_dim=32,
    # hidden_dim=32, num_heads=4 -> head_dim=8.
    B, N, D_IN, HID, HEADS = 2, 8, 32, 32, 4

    root = jax.random.PRNGKey(0)
    kx, kq, kk, kv = jax.random.split(root, 4)

    x = jax.random.normal(kx, (B, N, D_IN), jnp.float32)
    wq, bq = _init_linear(kq, D_IN, HID)
    wk, bk = _init_linear(kk, D_IN, HID)
    wv, bv = _init_linear(kv, D_IN, HID)

    def ref_proj(w, bias):
        out = jnp.dot(x.reshape(B * N, D_IN), w,
                      preferred_element_type=jnp.float32,
                      precision=lax.Precision.HIGHEST) + bias
        return out.reshape(B, N, HEADS, HID // HEADS)

    refs = [ref_proj(wq, bq), ref_proj(wk, bk), ref_proj(wv, bv)]

    # 1) Default path: f32 compute (matches the PyTorch module), auto
    #    resident/streaming selection from the chip-aware VMEM budget.
    outs = project_before_msa(x, wq, bq, wk, bk, wv, bv, num_heads=HEADS)
    jax.block_until_ready(outs)
    for o, r in zip(outs, refs):
        assert o.shape == (B, N, HEADS, HID // HEADS)
        assert o.dtype == x.dtype
        assert jnp.allclose(o, r, atol=2e-2), float(jnp.max(jnp.abs(o - r)))

    # 2) Forced streaming (column-tiled weight) path.
    outs_s = project_before_msa(x, wq, bq, wk, bk, wv, bv, num_heads=HEADS,
                                weight_resident=False)
    jax.block_until_ready(outs_s)
    for o, r in zip(outs_s, refs):
        assert o.shape == (B, N, HEADS, HID // HEADS)
        assert jnp.allclose(o, r, atol=2e-2), float(jnp.max(jnp.abs(o - r)))

    # 3) Explicit bf16 compute / bf16 outputs (opt-in, looser tolerance).
    outs_b = project_before_msa(x, wq, bq, wk, bk, wv, bv, num_heads=HEADS,
                                compute_dtype=jnp.bfloat16,
                                out_dtype=jnp.bfloat16)
    jax.block_until_ready(outs_b)
    for o, r in zip(outs_b, refs):
        assert o.dtype == jnp.bfloat16
        assert jnp.allclose(o.astype(jnp.float32), r, atol=8e-2)

    print("KERNEL_OK")
</pallas_src>

<mosaic_0001>
module attributes {stable_mosaic.version = 11 : i64} {
  func.func @_qkv_resident_kernel(%arg0: i32, %arg1: memref<16x128xf32, #tpu.memory_space<vmem>>, %arg2: memref<128x384xf32, #tpu.memory_space<vmem>>, %arg3: memref<1x384xf32, #tpu.memory_space<vmem>>, %arg4: memref<16x128xf32, #tpu.memory_space<vmem>>, %arg5: memref<16x128xf32, #tpu.memory_space<vmem>>, %arg6: memref<16x128xf32, #tpu.memory_space<vmem>>) attributes {dimension_semantics = [#tpu.dimension_semantics<parallel>], iteration_bounds = array<i64: 1>, scalar_prefetch = 0 : i64, scratch_operands = 0 : i64, tpu.core_type = #tpu.core_type<tc>, window_params = [{transform_indices = @transform_0, window_bounds = array<i64: 16, 128>}, {pipeline_mode = #tpu.pipeline_mode<synchronous>, transform_indices = @transform_1, window_bounds = array<i64: 128, 384>}, {pipeline_mode = #tpu.pipeline_mode<synchronous>, transform_indices = @transform_2, window_bounds = array<i64: 1, 384>}, {transform_indices = @transform_3, window_bounds = array<i64: 16, 128>}, {transform_indices = @transform_4, window_bounds = array<i64: 16, 128>}, {transform_indices = @transform_5, window_bounds = array<i64: 16, 128>}]} {
    %c0 = arith.constant 0 : index
    %c0_0 = arith.constant 0 : index
    %0 = vector.load %arg1[%c0, %c0_0] : memref<16x128xf32, #tpu.memory_space<vmem>>, vector<16x128xf32>
    %c0_1 = arith.constant 0 : index
    %c0_2 = arith.constant 0 : index
    %1 = vector.load %arg2[%c0_1, %c0_2] : memref<128x384xf32, #tpu.memory_space<vmem>>, vector<128x384xf32>
    %cst = arith.constant dense<0.000000e+00> : vector<16x384xf32>
    %2 = tpu.matmul %0, %1, %cst {dimension_numbers = #tpu.dot_dimension_numbers<[1], [0], [0], [1], [0, 0, 1, 1], [], []>} : vector<16x128xf32>, vector<128x384xf32>, vector<16x384xf32> -> vector<16x384xf32>
    %3 = vector.extract_strided_slice %2 {offsets = [0, 0], sizes = [16, 128], strides = [1, 1]} : vector<16x384xf32> to vector<16x128xf32>
    %c0_3 = arith.constant 0 : index
    %c0_4 = arith.constant 0 : index
    %4 = vector.load %arg3[%c0_3, %c0_4] : memref<1x384xf32, #tpu.memory_space<vmem>>, vector<1x128xf32>
    %5 = vector.broadcast %4 : vector<1x128xf32> to vector<16x128xf32>
    %6 = arith.addf %3, %5 : vector<16x128xf32>
    %c0_5 = arith.constant 0 : index
    %c0_6 = arith.constant 0 : index
    %7 = vector.load %arg4[%c0_5, %c0_6] : memref<16x128xf32, #tpu.memory_space<vmem>>, vector<16x128xf32>
    tpu.vector_store %arg4[%c0_5, %c0_6], %6 {strides = array<i32>} : memref<16x128xf32, #tpu.memory_space<vmem>>, vector<16x128xf32>,
    %8 = vector.extract_strided_slice %2 {offsets = [0, 128], sizes = [16, 128], strides = [1, 1]} : vector<16x384xf32> to vector<16x128xf32>
    %c0_7 = arith.constant 0 : index
    %c128 = arith.constant 128 : index
    %9 = vector.load %arg3[%c0_7, %c128] : memref<1x384xf32, #tpu.memory_space<vmem>>, vector<1x128xf32>
    %10 = vector.broadcast %9 : vector<1x128xf32> to vector<16x128xf32>
    %11 = arith.addf %8, %10 : vector<16x128xf32>
    %c0_8 = arith.constant 0 : index
    %c0_9 = arith.constant 0 : index
    %12 = vector.load %arg5[%c0_8, %c0_9] : memref<16x128xf32, #tpu.memory_space<vmem>>, vector<16x128xf32>
    tpu.vector_store %arg5[%c0_8, %c0_9], %11 {strides = array<i32>} : memref<16x128xf32, #tpu.memory_space<vmem>>, vector<16x128xf32>,
    %13 = vector.extract_strided_slice %2 {offsets = [0, 256], sizes = [16, 128], strides = [1, 1]} : vector<16x384xf32> to vector<16x128xf32>
    %c0_10 = arith.constant 0 : index
    %c256 = arith.constant 256 : index
    %14 = vector.load %arg3[%c0_10, %c256] : memref<1x384xf32, #tpu.memory_space<vmem>>, vector<1x128xf32>
    %15 = vector.broadcast %14 : vector<1x128xf32> to vector<16x128xf32>
    %16 = arith.addf %13, %15 : vector<16x128xf32>
    %c0_11 = arith.constant 0 : index
    %c0_12 = arith.constant 0 : index
    %17 = vector.load %arg6[%c0_11, %c0_12] : memref<16x128xf32, #tpu.memory_space<vmem>>, vector<16x128xf32>
    tpu.vector_store %arg6[%c0_11, %c0_12], %16 {strides = array<i32>} : memref<16x128xf32, #tpu.memory_space<vmem>>, vector<16x128xf32>,
    return
  }
  func.func @transform_0(%arg0: i32) -> (i32, i32) {
    %c0_i32 = arith.constant 0 : i32
    %c0_i32_0 = arith.constant 0 : i32
    return %arg0, %c0_i32 : i32, i32
  }
  func.func @transform_1(%arg0: i32) -> (i32, i32) {
    %c0_i32 = arith.constant 0 : i32
    %c0_i32_0 = arith.constant 0 : i32
    %c0_i32_1 = arith.constant 0 : i32
    return %c0_i32, %c0_i32_0 : i32, i32
  }
  func.func @transform_2(%arg0: i32) -> (i32, i32) {
    %c0_i32 = arith.constant 0 : i32
    %c0_i32_0 = arith.constant 0 : i32
    %c0_i32_1 = arith.constant 0 : i32
    return %c0_i32, %c0_i32_0 : i32, i32
  }
  func.func @transform_3(%arg0: i32) -> (i32, i32) {
    %c0_i32 = arith.constant 0 : i32
    %c0_i32_0 = arith.constant 0 : i32
    return %arg0, %c0_i32 : i32, i32
  }
  func.func @transform_4(%arg0: i32) -> (i32, i32) {
    %c0_i32 = arith.constant 0 : i32
    %c0_i32_0 = arith.constant 0 : i32
    return %arg0, %c0_i32 : i32, i32
  }
  func.func @transform_5(%arg0: i32) -> (i32, i32) {
    %c0_i32 = arith.constant 0 : i32
    %c0_i32_0 = arith.constant 0 : i32
    return %arg0, %c0_i32 : i32, i32
  }
}

</mosaic_0001>

<bundles_post_ra>
// kernel: project_before_msa.1
= control target key start
LH: loop header
LB: loop body
LE: loop exit
PB: predicated region body
PF: predicated region fallthrough
CT: control target
= control target key end

     0   :  { %v321_v3 = vmov 0.0   ;;  %s531_s1 = inlined_call_operand.vmem [shape: f32[128,384], index: 1, kind: input, shape index: {}]   ;;  %s532_s0 = inlined_call_operand.vmem [shape: f32[16,128], index: 0, kind: input, shape index: {}]   ;;  %s533_s2 = inlined_call_operand.vmem [shape: f32[1,384], index: 2, kind: input, shape index: {}]   ;;  %s534_s3 = inlined_call_operand.vmem [shape: f32[16,128], index: 3, kind: output, shape index: {0}]   ;;  %s535_s4 = inlined_call_operand.vmem [shape: f32[16,128], index: 4, kind: output, shape index: {1}]   ;;  %s536_s5 = inlined_call_operand.vmem [shape: f32[16,128], index: 5, kind: output, shape index: {2}]  }
   0x1   :  { %v65_v0 = vld [vmem:[%s531_s1 + $0x170] sm:$0xff]  ;;  %v64_v1 = vld [vmem:[%s531_s1 + $0x168] sm:$0xff]  ;;  %v62_v2 = vld [vmem:[%s531_s1 + $0x158] sm:$0xff]  ;;  %131 = vmatprep.mubr.f32.mxu0 %v321_v3 }
   0x2   :  { %67 = vmatprep.subr.mxu0 %v65_v0  ;;  %v66_v4 = vld [vmem:[%s531_s1 + $0x178] sm:$0xff]  ;;  %v61_v5 = vld [vmem:[%s531_s1 + $0x150] sm:$0xff]  ;;  %v59_v6 = vld [vmem:[%s531_s1 + $0x140] sm:$0xff] }
   0x3   :  { %68 = vmatpush1.msra.mxu0 %v64_v1  ;;  %285 = vmatprep.subr.mxu1 %v66_v4  ;;  %v63_v7 = vld [vmem:[%s531_s1 + $0x160] sm:$0xff]  ;;  %v58_v8 = vld [vmem:[%s531_s1 + $0x138] sm:$0xff]  ;;  %v60_v9 = vld [vmem:[%s531_s1 + $0x148] sm:$0xff] }
   0x4   :  { %69 = vmatprep.subr.mxu0 %v62_v2  ;;  %286 = vmatpush3.msra.mxu1 %v66_v4  ;;  %v56_v10 = vld [vmem:[%s531_s1 + $0x128] sm:$0xff]  ;;  %v55_v11 = vld [vmem:[%s531_s1 + $0x120] sm:$0xff]  ;;  %v57_v12 = vld [vmem:[%s531_s1 + $0x130] sm:$0xff] }
   0x5   :  { %70 = vmatpush1.msra.mxu0 %v61_v5  ;;  %287 = vmatprep.subr.mxu1 %v63_v7  ;;  %v53_v13 = vld [vmem:[%s531_s1 + $0x110] sm:$0xff]  ;;  %v52_v14 = vld [vmem:[%s531_s1 + $0x108] sm:$0xff]  ;;  %v54_v15 = vld [vmem:[%s531_s1 + $0x118] sm:$0xff] }
   0x6   :  { %71 = vmatprep.subr.mxu0 %v59_v6  ;;  %288 = vmatpush3.msra.mxu1 %v63_v7  ;;  %v50_v16 = vld [vmem:[%s531_s1 + $0xf8] sm:$0xff]  ;;  %v49_v17 = vld [vmem:[%s531_s1 + $0xf0] sm:$0xff]  ;;  %v51_v18 = vld [vmem:[%s531_s1 + $0x100] sm:$0xff] }
   0x7   :  { %72 = vmatpush1.msra.mxu0 %v58_v8  ;;  %289 = vmatprep.subr.mxu1 %v60_v9  ;;  %v47_v19 = vld [vmem:[%s531_s1 + $0xe0] sm:$0xff]  ;;  %v46_v20 = vld [vmem:[%s531_s1 + $0xd8] sm:$0xff]  ;;  %v48_v21 = vld [vmem:[%s531_s1 + $0xe8] sm:$0xff] }
   0x8   :  { %73 = vmatprep.subr.mxu0 %v56_v10  ;;  %290 = vmatpush3.msra.mxu1 %v60_v9  ;;  %v44_v22 = vld [vmem:[%s531_s1 + $0xc8] sm:$0xff]  ;;  %v43_v23 = vld [vmem:[%s531_s1 + $0xc0] sm:$0xff]  ;;  %v45_v24 = vld [vmem:[%s531_s1 + $0xd0] sm:$0xff] }
   0x9   :  { %74 = vmatpush1.msra.mxu0 %v55_v11  ;;  %291 = vmatprep.subr.mxu1 %v57_v12  ;;  %v41_v25 = vld [vmem:[%s531_s1 + $0xb0] sm:$0xff]  ;;  %v40_v26 = vld [vmem:[%s531_s1 + $0xa8] sm:$0xff]  ;;  %v42_v27 = vld [vmem:[%s531_s1 + $0xb8] sm:$0xff] }
   0xa   :  { %75 = vmatprep.subr.mxu0 %v53_v13  ;;  %292 = vmatpush3.msra.mxu1 %v57_v12  ;;  %v38_v28 = vld [vmem:[%s531_s1 + $0x98] sm:$0xff]  ;;  %v37_v29 = vld [vmem:[%s531_s1 + $0x90] sm:$0xff]  ;;  %v39_v30 = vld [vmem:[%s531_s1 + $0xa0] sm:$0xff] }
   0xb   :  { %76 = vmatpush1.msra.mxu0 %v52_v14  ;;  %293 = vmatprep.subr.mxu1 %v54_v15  ;;  %v35_v31 = vld [vmem:[%s531_s1 + $0x80] sm:$0xff]  ;;  %v34_v32 = vld [vmem:[%s531_s1 + $0x78] sm:$0xff]  ;;  %v36_v33 = vld [vmem:[%s531_s1 + $0x88] sm:$0xff] }
   0xc   :  { %77 = vmatprep.subr.mxu0 %v50_v16  ;;  %294 = vmatpush3.msra.mxu1 %v54_v15  ;;  %v32_v34 = vld [vmem:[%s531_s1 + $0x68] sm:$0xff]  ;;  %v31_v35 = vld [vmem:[%s531_s1 + $0x60] sm:$0xff]  ;;  %v33_v36 = vld [vmem:[%s531_s1 + $0x70] sm:$0xff] }
   0xd   :  { %78 = vmatpush1.msra.mxu0 %v49_v17  ;;  %295 = vmatprep.subr.mxu1 %v51_v18  ;;  %v29_v37 = vld [vmem:[%s531_s1 + $0x50] sm:$0xff]  ;;  %v28_v38 = vld [vmem:[%s531_s1 + $0x48] sm:$0xff]  ;;  %v30_v39 = vld [vmem:[%s531_s1 + $0x58] sm:$0xff] }
   0xe   :  { %79 = vmatprep.subr.mxu0 %v47_v19  ;;  %296 = vmatpush3.msra.mxu1 %v51_v18  ;;  %v26_v40 = vld [vmem:[%s531_s1 + $0x38] sm:$0xff]  ;;  %v25_v41 = vld [vmem:[%s531_s1 + $0x30] sm:$0xff]  ;;  %v27_v42 = vld [vmem:[%s531_s1 + $0x40] sm:$0xff] }
   0xf   :  { %80 = vmatpush1.msra.mxu0 %v46_v20  ;;  %297 = vmatprep.subr.mxu1 %v48_v21  ;;  %v23_v43 = vld [vmem:[%s531_s1 + $0x20] sm:$0xff]  ;;  %v22_v44 = vld [vmem:[%s531_s1 + $0x18] sm:$0xff]  ;;  %v24_v45 = vld [vmem:[%s531_s1 + $0x28] sm:$0xff] }
  0x10   :  { %81 = vmatprep.subr.mxu0 %v44_v22  ;;  %298 = vmatpush3.msra.mxu1 %v48_v21  ;;  %v20_v46 = vld [vmem:[%s531_s1 + $0x8] sm:$0xff]  ;;  %v19_v47 = vld [vmem:[%s531_s1] sm:$0xff]  ;;  %v21_v48 = vld [vmem:[%s531_s1 + $0x10] sm:$0xff] }
  0x11   :  { %82 = vmatpush1.msra.mxu0 %v43_v23  ;;  %299 = vmatprep.subr.mxu1 %v45_v24  ;;  %v17_v49 = vld [vmem:[%s532_s0] sm:$0xff]  ;;  %v18_v50 = vld [vmem:[%s532_s0 + $0x8] sm:$0xff] }
  0x12   :  { %83 = vmatprep.subr.mxu0 %v41_v25  ;;  %300 = vmatpush3.msra.mxu1 %v45_v24  ;;  %v264_v51 = vld [vmem:[%s533_s2] ss:$0 sm:$0xff]  ;;  %v265_v53 = vld [vmem:[%s533_s2 + $0x1] ss:$0 sm:$0xff]  ;;  %v266_v54 = vld [vmem:[%s533_s2 + $0x2] ss:$0 sm:$0xff] }
  0x13   :  { %84 = vmatpush1.msra.mxu0 %v40_v26  ;;  %301 = vmatprep.subr.mxu1 %v42_v27 }
  0x14   :  { %85 = vmatprep.subr.mxu0 %v38_v28  ;;  %302 = vmatpush3.msra.mxu1 %v42_v27 }
  0x15   :  { %86 = vmatpush1.msra.mxu0 %v37_v29  ;;  %303 = vmatprep.subr.mxu1 %v39_v30 }
  0x16   :  { %87 = vmatprep.subr.mxu0 %v35_v31  ;;  %304 = vmatpush3.msra.mxu1 %v39_v30 }
  0x17   :  { %88 = vmatpush1.msra.mxu0 %v34_v32  ;;  %305 = vmatprep.subr.mxu1 %v36_v33 }
  0x18   :  { %89 = vmatprep.subr.mxu0 %v32_v34  ;;  %306 = vmatpush3.msra.mxu1 %v36_v33 }
  0x19   :  { %90 = vmatpush1.msra.mxu0 %v31_v35  ;;  %307 = vmatprep.subr.mxu1 %v33_v36 }
  0x1a   :  { %91 = vmatprep.subr.mxu0 %v29_v37  ;;  %308 = vmatpush3.msra.mxu1 %v33_v36 }
  0x1b   :  { %92 = vmatpush1.msra.mxu0 %v28_v38  ;;  %309 = vmatprep.subr.mxu1 %v30_v39 }
  0x1c   :  { %93 = vmatprep.subr.mxu0 %v26_v40  ;;  %310 = vmatpush3.msra.mxu1 %v30_v39 }
  0x1d   :  { %94 = vmatpush1.msra.mxu0 %v25_v41  ;;  %311 = vmatprep.subr.mxu1 %v27_v42 }
  0x1e   :  { %95 = vmatprep.subr.mxu0 %v23_v43  ;;  %312 = vmatpush3.msra.mxu1 %v27_v42 }
  0x1f   :  { %96 = vmatpush1.msra.mxu0 %v22_v44  ;;  %313 = vmatprep.subr.mxu1 %v24_v45 }
  0x20   :  { %97 = vmatprep.subr.mxu0 %v20_v46  ;;  %314 = vmatpush3.msra.mxu1 %v24_v45 }
  0x21   :  { %98 = vmatpush1.msra.mxu0 %v19_v47  ;;  %315 = vmatprep.subr.mxu1 %v21_v48 }
  0x22   :  { %132 = vmatmul.mubr.f32.vlgmr.msra.gmra.mxu0 %v17_v49  ;;  %316 = vmatpush3.msra.mxu1 %v21_v48 }
  0x23   :  { %317 = vmatprep.mubr.f32.mxu1 %v17_v49  ;;  %137 = vmatprep.mubr.f32.mxu0 %v321_v3 }
  0x24   :  { %318 = vmatmul.mubr.f32.vlgmr.msra.gmra.mxu1 %v18_v50 }
  0x26   :  { %138 = vmatmul.mubr.f32.gmra.mxu0 %v18_v50 }
  0xe2   :  { %v133_v52 = vpop.f32.mrf.mxu0 }
  0xe3   :  { %v226_v55 = vadd.f32 %v264_v51, %v133_v52 }
  0xe4   :  { %v135_v56 = vpop.f32.mrf.mxu0  ;;  %v319_v57 = vpop.f32.mrf.mxu1 }
  0xe5   :  { %228 = vst [vmem:[%s534_s3] sm:$0xff] %v226_v55  ;;  %v237_v58 = vadd.f32 %v265_v53, %v135_v56  ;;  %v249_v59 = vadd.f32 %v319_v57, %v266_v54 }
  0xe6   :  { %v139_v60 = vpop.f32.mrf.mxu0  ;;  %v210_v61 = vpop.f32.mrf.mxu1 }
  0xe7   :  { %239 = vst [vmem:[%s535_s4] sm:$0xff] %v237_v58  ;;  %251 = vst [vmem:[%s536_s5 + $0x8] sm:$0xff] %v249_v59  ;;  %v227_v62 = vadd.f32 %v264_v51, %v139_v60  ;;  %v248_v63 = vadd.f32 %v266_v54, %v210_v61 }
  0xe8   :  { %v141_v0 = vpop.f32.mrf.mxu0 }
  0xe9   :  { %229 = vst [vmem:[%s534_s3 + $0x8] sm:$0xff] %v227_v62  ;;  %250 = vst [vmem:[%s536_s5] sm:$0xff] %v248_v63  ;;  %v238_v1 = vadd.f32 %v265_v53, %v141_v0 }
  0xeb   :  { %240 = vst [vmem:[%s535_s4 + $0x8] sm:$0xff] %v238_v1 }

</bundles_post_ra>
